<compile_context>
chip_gen: v6e
topology: v6e:2x2x1
jax: 0.10.0
libtpu: 0.0.40
codegen_flags: <defaults>
</compile_context>

<pallas_src>
import functools

import jax
import jax.numpy as jnp
from jax.experimental import pallas as pl
from jax.experimental.pallas import tpu as pltpu


def _round_up(x, m):
    return ((x + m - 1) // m) * m


# ----------------------------------------------------------------------------
# Glue: centred crop-or-zero-pad on the trailing two axes (dflat resize_with_crop_or_pad)
# ----------------------------------------------------------------------------
def _resize_with_crop_or_pad(x, target_h, target_w):
    h, w = x.shape[-2], x.shape[-1]
    if h > target_h:
        t0 = (h - target_h) // 2
        x = x[..., t0:t0 + target_h, :]
    if w > target_w:
        l0 = (w - target_w) // 2
        x = x[..., :, l0:l0 + target_w]
    h, w = x.shape[-2], x.shape[-1]
    if h < target_h or w < target_w:
        pt = (target_h - h) // 2
        pb = target_h - h - pt
        pleft = (target_w - w) // 2
        pright = target_w - w - pleft
        pads = [(0, 0)] * (x.ndim - 2) + [(pt, pb), (pleft, pright)]
        x = jnp.pad(x, pads)
    return x


# ----------------------------------------------------------------------------
# Channel-independent DFT operator matrices (built once in plain JAX, bf16,
# zero-padded bottom/right to the lane/sublane-aligned sizes).
# ----------------------------------------------------------------------------
def _trig_matrix(rows, cols, n, pad_rows, pad_cols, row_offset=0, col_offset=0, scale=1.0):
    # cos/sin of 2*pi*(r+row_offset)*(c+col_offset)/n with the integer product reduced
    # mod n first so the trig argument stays small/accurate in f32.
    # TODO(synk): the int32 modular product overflows for padded sizes n > 46340.
    r = (jnp.arange(rows, dtype=jnp.int32) + row_offset) % n
    c = (jnp.arange(cols, dtype=jnp.int32) + col_offset) % n
    m = (r[:, None] * c[None, :]) % n
    ang = (2.0 * jnp.pi / n) * m.astype(jnp.float32)
    cosm = jnp.cos(ang) * scale
    sinm = jnp.sin(ang) * scale
    pads = ((0, pad_rows - rows), (0, pad_cols - cols))
    return (jnp.pad(cosm, pads).astype(jnp.bfloat16),
            jnp.pad(sinm, pads).astype(jnp.bfloat16))


# ----------------------------------------------------------------------------
# Kernel 1 (prepass): forward DFT2 of one scene channel (6 bf16 MXU dots).
# ----------------------------------------------------------------------------
def _dft2_fwd_kernel(img_ref, cy_ref, sy_ref, cx_ref, sx_ref, xr_ref, xi_ref):
    f32, bf16 = jnp.float32, jnp.bfloat16
    dot = functools.partial(jnp.dot, preferred_element_type=f32)
    img = img_ref[0, 0, 0, 0].astype(bf16)                 # (Py_a, Px_a)
    p = dot(cy_ref[...], img).astype(bf16)
    q = dot(sy_ref[...], img).astype(bf16)
    xr_ref[0, 0, 0, 0] = dot(p, cx_ref[...]) - dot(q, sx_ref[...])
    xi_ref[0, 0, 0, 0] = -(dot(p, sx_ref[...]) + dot(q, cx_ref[...]))


# ----------------------------------------------------------------------------
# Kernel 2 (main): PSF DFT2 + spectral complex product + centred inverse DFT2
# (12 bf16 MXU dots; centre shift and 1/(Py*Px) are folded into icy/isy/icx/isx).
# ----------------------------------------------------------------------------
def _spectral_conv_kernel(xr_ref, xi_ref, psf_ref,
                          cy_ref, sy_ref, cx_ref, sx_ref,
                          icy_ref, isy_ref, icx_ref, isx_ref,
                          out_ref):
    f32, bf16 = jnp.float32, jnp.bfloat16
    dot = functools.partial(jnp.dot, preferred_element_type=f32)

    # Forward DFT of the PSF (bf16 in / f32 accumulate).
    psf = psf_ref[0, 0, 0, 0].astype(bf16)
    p = dot(cy_ref[...], psf).astype(bf16)
    q = dot(sy_ref[...], psf).astype(bf16)
    hr = dot(p, cx_ref[...]) - dot(q, sx_ref[...])
    hi = -(dot(p, sx_ref[...]) + dot(q, cx_ref[...]))

    # Pointwise complex product (f32 on the VPU).
    xr = xr_ref[0, 0, 0, 0]
    xi = xi_ref[0, 0, 0, 0]
    zr = (xr * hr - xi * hi).astype(bf16)
    zi = (xr * hi + xi * hr).astype(bf16)

    # Centred inverse DFT, real part (shift + 1/(Py*Px) folded into the operators).
    u = (dot(icy_ref[...], zr) - dot(isy_ref[...], zi)).astype(bf16)
    v = (dot(icy_ref[...], zi) + dot(isy_ref[...], zr)).astype(bf16)
    out_ref[0, 0, 0, 0] = dot(u, icx_ref[...]) - dot(v, isx_ref[...])


# ----------------------------------------------------------------------------
# Wrapper: centred circular convolution of the padded image with the padded PSF.
# Returns an (..., Py_a, Px_a) f32 array whose top-left (Py, Px) window is valid.
# ----------------------------------------------------------------------------
def _centered_circular_convolve(image_pad, filt_pad):
    Bs, Ps, Zs, Ls, Py, Px = image_pad.shape
    B, P, Z, L, Py2, Px2 = filt_pad.shape
    assert (Py, Px) == (Py2, Px2)
    assert Bs in (1, B) and Ps in (1, P) and Zs in (1, Z) and Ls in (1, L), \
        "scene_radiance leading dims must be 1 or match the PSF dims"

    # Aligned tile sizes: last dim multiple of 128 (lane-dense stores / full MXU
    # columns), second-last multiple of 16 (bf16 sublane packing).
    Py_a = _round_up(Py, 16)
    Px_a = _round_up(Px, 128)

    # Forward operators (for image and PSF spectra).
    cy, sy = _trig_matrix(Py, Py, Py, Py_a, Py_a)
    cx, sx = _trig_matrix(Px, Px, Px, Px_a, Px_a)
    # Inverse operators with the centre shift folded in; 1/(Py*Px) folded into X.
    icy, isy = _trig_matrix(Py, Py, Py, Py_a, Py_a, row_offset=Py // 2)
    icx, isx = _trig_matrix(Px, Px, Px, Px_a, Px_a, col_offset=Px // 2,
                            scale=1.0 / float(Py * Px))

    # Zero-extend tiles bottom/right to the aligned sizes (valid data stays at
    # [0:Py, 0:Px], matching the zero-padded operators). Stream f32; cast in-kernel.
    pad6 = [(0, 0)] * 4 + [(0, Py_a - Py), (0, Px_a - Px)]
    img = jnp.pad(image_pad, pad6)
    psf = jnp.pad(filt_pad, pad6)

    tile = (1, 1, 1, 1, Py_a, Px_a)

    def id_map(b, p, z, l):
        return (b, p, z, l, 0, 0)

    def op_map(b, p, z, l):
        return (0, 0)

    # ---- Pass 1: DFT2 of each distinct scene channel (reused across broadcast dims).
    n_sc = Bs * Ps * Zs * Ls
    fwd_flops = int(n_sc * (4 * Py_a * Py_a * Px_a + 8 * Py_a * Px_a * Px_a))
    fwd_bytes = int(n_sc * 3 * Py_a * Px_a * 4 + 4 * (Py_a * Py_a + Px_a * Px_a) * 2)
    spec_shape = jax.ShapeDtypeStruct((Bs, Ps, Zs, Ls, Py_a, Px_a), jnp.float32)
    xr, xi = pl.pallas_call(
        _dft2_fwd_kernel,
        out_shape=(spec_shape, spec_shape),
        grid=(Bs, Ps, Zs, Ls),
        in_specs=[
            pl.BlockSpec(tile, id_map),
            pl.BlockSpec((Py_a, Py_a), op_map),
            pl.BlockSpec((Py_a, Py_a), op_map),
            pl.BlockSpec((Px_a, Px_a), op_map),
            pl.BlockSpec((Px_a, Px_a), op_map),
        ],
        out_specs=(pl.BlockSpec(tile, id_map), pl.BlockSpec(tile, id_map)),
        compiler_params=pltpu.CompilerParams(dimension_semantics=("parallel",) * 4),
        cost_estimate=pl.CostEstimate(flops=fwd_flops, transcendentals=0,
                                      bytes_accessed=fwd_bytes),
    )(img, cy, sy, cx, sx)

    # ---- Pass 2: PSF spectrum, spectral product, centred inverse DFT per channel.
    def bcast_map(b, p, z, l):
        return (b if Bs > 1 else 0, p if Ps > 1 else 0,
                z if Zs > 1 else 0, l if Ls > 1 else 0, 0, 0)

    n_ch = B * P * Z * L
    main_flops = int(n_ch * (12 * Py_a * Py_a * Px_a + 12 * Py_a * Px_a * Px_a))
    main_bytes = int(n_ch * 4 * Py_a * Px_a * 4 + 8 * (Py_a * Py_a + Px_a * Px_a) * 2)

    # Raise scoped VMEM only when the per-step footprint needs it (large padded sizes).
    op_bytes = 8 * (Py_a * Py_a + Px_a * Px_a) * 2            # 8 bf16 operator matrices
    step_bytes = 2 * op_bytes + 18 * 4 * Py_a * Px_a          # buffers + live temporaries
    cp_kwargs = dict(dimension_semantics=("parallel",) * 4)
    if step_bytes > 12 * 1024 * 1024:
        cp_kwargs["vmem_limit_bytes"] = int(min(2 * step_bytes, 96 * 1024 * 1024))
    # TODO(synk): for very large padded sizes (Px_a >~ 2k) the X contraction should be
    # tiled over Px chunks with an f32 accumulator (and on v7x the constant operator
    # inputs single-buffered) to fit the 64 MiB VMEM.
    # TODO(synk): for very small PSFs, batching several (z,l) channels per grid step
    # would fill the MXU rows and amortise the ~0.35us per-step overhead.

    out = pl.pallas_call(
        _spectral_conv_kernel,
        out_shape=jax.ShapeDtypeStruct((B, P, Z, L, Py_a, Px_a), jnp.float32),
        grid=(B, P, Z, L),
        in_specs=[
            pl.BlockSpec(tile, bcast_map),       # xr (scene spectrum, broadcast)
            pl.BlockSpec(tile, bcast_map),       # xi
            pl.BlockSpec(tile, id_map),          # psf
            pl.BlockSpec((Py_a, Py_a), op_map),  # cy
            pl.BlockSpec((Py_a, Py_a), op_map),  # sy
            pl.BlockSpec((Px_a, Px_a), op_map),  # cx
            pl.BlockSpec((Px_a, Px_a), op_map),  # sx
            pl.BlockSpec((Py_a, Py_a), op_map),  # icy
            pl.BlockSpec((Py_a, Py_a), op_map),  # isy
            pl.BlockSpec((Px_a, Px_a), op_map),  # icx
            pl.BlockSpec((Px_a, Px_a), op_map),  # isx
        ],
        out_specs=pl.BlockSpec(tile, id_map),
        compiler_params=pltpu.CompilerParams(**cp_kwargs),
        cost_estimate=pl.CostEstimate(flops=main_flops, transcendentals=0,
                                      bytes_accessed=main_bytes),
    )(xr, xi, psf, cy, sy, cx, sx, icy, isy, icx, isx)
    return out


# ----------------------------------------------------------------------------
# general_convolve (dflat.render) reimplemented with the Pallas spectral kernels
# ----------------------------------------------------------------------------
def general_convolve(image, filt, rfft=True):
    # `rfft` kept for API parity: with real inputs the rfft and fft paths of
    # fourier_convolve are numerically identical; the spectral MXU kernel covers both.
    init_h, init_w = image.shape[-2], image.shape[-1]
    filt_h, filt_w = filt.shape[-2], filt.shape[-1]

    # If the image is smaller than the filter, zero-pad the image up to the filter size.
    if init_h < filt_h or init_w < filt_w:
        image = _resize_with_crop_or_pad(image, max(init_h, filt_h), max(init_w, filt_w))

    # Zero pad the image with half the filter dimensionality (reference convention).
    pads = [(0, 0)] * (image.ndim - 2) + [(filt_h // 2, filt_h // 2),
                                          (filt_w // 2, filt_w // 2)]
    image = jnp.pad(image, pads)
    Py, Px = image.shape[-2], image.shape[-1]

    # Zero pad the filter (centred) to match the padded image size.
    filt_p = _resize_with_crop_or_pad(filt, Py, Px)

    # Centred circular convolution on the MXU; valid region is [0:Py, 0:Px].
    out_a = _centered_circular_convolve(image, filt_p)

    # Single centred crop back to the original image size (matches resize_with_crop_or_pad).
    ty = (Py - init_h) // 2
    tx = (Px - init_w) // 2
    return out_a[..., ty:ty + init_h, tx:tx + init_w]


# ----------------------------------------------------------------------------
# The module (no learnable parameters in __init__)
# ----------------------------------------------------------------------------
class FrontoPlanarRendererIncoherent:
    def __call__(self, psf_intensity, scene_radiance, rfft=True, crop_to_psf_dim=False):
        return self.forward(psf_intensity, scene_radiance, rfft, crop_to_psf_dim)

    def forward(self, psf_intensity, scene_radiance, rfft=True, crop_to_psf_dim=False):
        scene_radiance = jnp.asarray(scene_radiance)
        psf_intensity = jnp.asarray(psf_intensity)
        if scene_radiance.ndim == 5:
            scene_radiance = scene_radiance[None]
        psf_shape = psf_intensity.shape
        srad_shape = scene_radiance.shape
        assert len(psf_shape) == 6, "PSF should be rank 6 tensor like [B P Z L H W]."
        assert len(srad_shape) == 6, "Scene radiance should be passed as a rank 5 tensor like [P Z L H W]"
        for i in range(1, 4):
            assert srad_shape[i] == psf_shape[i] or srad_shape[i] == 1

        psf_intensity = psf_intensity.astype(jnp.float32)
        scene_radiance = scene_radiance.astype(jnp.float32)

        # torch.utils.checkpoint only affects backward memory; forward semantics unchanged.
        meas = general_convolve(scene_radiance, psf_intensity, rfft)
        if crop_to_psf_dim:
            # TODO(synk): faithful to the reference, which discards the result of this crop.
            _ = _resize_with_crop_or_pad(meas, psf_intensity.shape[-2], psf_intensity.shape[-1])
        return meas


# ----------------------------------------------------------------------------
# Pure-JAX FFT reference of the same pipeline (for a self-check)
# ----------------------------------------------------------------------------
def _general_convolve_fft_reference(image, filt):
    init_h, init_w = image.shape[-2], image.shape[-1]
    filt_h, filt_w = filt.shape[-2], filt.shape[-1]
    if init_h < filt_h or init_w < filt_w:
        image = _resize_with_crop_or_pad(image, max(init_h, filt_h), max(init_w, filt_w))
    pads = [(0, 0)] * (image.ndim - 2) + [(filt_h // 2, filt_h // 2),
                                          (filt_w // 2, filt_w // 2)]
    image = jnp.pad(image, pads)
    Py, Px = image.shape[-2], image.shape[-1]
    filt = _resize_with_crop_or_pad(filt, Py, Px)
    Fi = jnp.fft.rfft2(jnp.fft.ifftshift(image, axes=(-2, -1)))
    Ff = jnp.fft.rfft2(jnp.fft.ifftshift(filt, axes=(-2, -1)))
    out = jnp.fft.fftshift(jnp.fft.irfft2(Fi * Ff, s=(Py, Px)), axes=(-2, -1)).real
    return _resize_with_crop_or_pad(out, init_h, init_w)


if __name__ == "__main__":
    key = jax.random.PRNGKey(0)
    k1, k2, k3, k4 = jax.random.split(key, 4)
    renderer = FrontoPlanarRendererIncoherent()

    # --- Test 1: even sizes, broadcast over B and Z -------------------------
    B, P, Z, L, Hp, Wp = 2, 1, 2, 3, 16, 16
    Hs, Ws = 16, 16
    psf = jax.random.uniform(k1, (B, P, Z, L, Hp, Wp), jnp.float32)
    psf = psf / jnp.sum(psf, axis=(-2, -1), keepdims=True)            # normalized PSFs
    scene = jax.random.uniform(k2, (P, 1, L, Hs, Ws), jnp.float32)    # rank-5, Z broadcast

    meas = renderer(psf, scene, rfft=True, crop_to_psf_dim=False)
    meas = jax.block_until_ready(meas)
    assert meas.shape == (B, P, Z, L, Hs, Ws), meas.shape
    assert meas.dtype == jnp.float32

    ref = _general_convolve_fft_reference(jnp.asarray(scene, jnp.float32)[None], psf)
    ref = jax.block_until_ready(ref)
    rel_err = float(jnp.max(jnp.abs(meas - ref)) / jnp.maximum(jnp.max(jnp.abs(ref)), 1e-6))
    assert rel_err < 3e-2, f"even-size mismatch vs FFT reference: rel_err={rel_err}"

    # --- Test 2: odd filter / odd padded sizes (exercises the folded shift) --
    psf2 = jax.random.uniform(k3, (1, 1, 1, 2, 5, 7), jnp.float32)
    scene2 = jax.random.uniform(k4, (1, 1, 2, 11, 13), jnp.float32)
    meas2 = renderer(psf2, scene2)
    meas2 = jax.block_until_ready(meas2)
    assert meas2.shape == (1, 1, 1, 2, 11, 13), meas2.shape
    ref2 = _general_convolve_fft_reference(jnp.asarray(scene2, jnp.float32)[None], psf2)
    ref2 = jax.block_until_ready(ref2)
    rel_err2 = float(jnp.max(jnp.abs(meas2 - ref2)) / jnp.maximum(jnp.max(jnp.abs(ref2)), 1e-6))
    assert rel_err2 < 3e-2, f"odd-size mismatch vs FFT reference: rel_err={rel_err2}"

    print("KERNEL_OK")
</pallas_src>

<mosaic_0001>
module attributes {stable_mosaic.version = 11 : i64} {
  func.func @_dft2_fwd_kernel(%arg0: i32, %arg1: i32, %arg2: i32, %arg3: i32, %arg4: memref<1x1x1x1x32x128xf32, #tpu.memory_space<vmem>>, %arg5: memref<32x32xbf16, #tpu.memory_space<vmem>>, %arg6: memref<32x32xbf16, #tpu.memory_space<vmem>>, %arg7: memref<128x128xbf16, #tpu.memory_space<vmem>>, %arg8: memref<128x128xbf16, #tpu.memory_space<vmem>>, %arg9: memref<1x1x1x1x32x128xf32, #tpu.memory_space<vmem>>, %arg10: memref<1x1x1x1x32x128xf32, #tpu.memory_space<vmem>>) attributes {dimension_semantics = [#tpu.dimension_semantics<parallel>, #tpu.dimension_semantics<parallel>, #tpu.dimension_semantics<parallel>, #tpu.dimension_semantics<parallel>], iteration_bounds = array<i64: 1, 1, 1, 3>, scalar_prefetch = 0 : i64, scratch_operands = 0 : i64, tpu.core_type = #tpu.core_type<tc>, window_params = [{transform_indices = @transform_0, window_bounds = array<i64: 1, 1, 1, 1, 32, 128>}, {pipeline_mode = #tpu.pipeline_mode<synchronous>, transform_indices = @transform_1, window_bounds = array<i64: 32, 32>}, {pipeline_mode = #tpu.pipeline_mode<synchronous>, transform_indices = @transform_2, window_bounds = array<i64: 32, 32>}, {pipeline_mode = #tpu.pipeline_mode<synchronous>, transform_indices = @transform_3, window_bounds = array<i64: 128, 128>}, {pipeline_mode = #tpu.pipeline_mode<synchronous>, transform_indices = @transform_4, window_bounds = array<i64: 128, 128>}, {transform_indices = @transform_5, window_bounds = array<i64: 1, 1, 1, 1, 32, 128>}, {transform_indices = @transform_6, window_bounds = array<i64: 1, 1, 1, 1, 32, 128>}]} {
    %c0 = arith.constant 0 : index
    %c0_0 = arith.constant 0 : index
    %c0_1 = arith.constant 0 : index
    %c0_2 = arith.constant 0 : index
    %c0_3 = arith.constant 0 : index
    %c0_4 = arith.constant 0 : index
    %0 = vector.load %arg4[%c0, %c0_0, %c0_1, %c0_2, %c0_3, %c0_4] : memref<1x1x1x1x32x128xf32, #tpu.memory_space<vmem>>, vector<1x1x1x1x32x128xf32>
    %1 = vector.shape_cast %0 : vector<1x1x1x1x32x128xf32> to vector<32x128xf32>
    %2 = arith.truncf %1 : vector<32x128xf32> to vector<32x128xbf16>
    %c0_5 = arith.constant 0 : index
    %c0_6 = arith.constant 0 : index
    %3 = vector.load %arg5[%c0_5, %c0_6] : memref<32x32xbf16, #tpu.memory_space<vmem>>, vector<32x32xbf16>
    %cst = arith.constant dense<0.000000e+00> : vector<32x128xf32>
    %4 = tpu.matmul %3, %2, %cst {dimension_numbers = #tpu.dot_dimension_numbers<[1], [0], [0], [1], [0, 0, 1, 1], [], []>} : vector<32x32xbf16>, vector<32x128xbf16>, vector<32x128xf32> -> vector<32x128xf32>
    %5 = arith.truncf %4 : vector<32x128xf32> to vector<32x128xbf16>
    %c0_7 = arith.constant 0 : index
    %c0_8 = arith.constant 0 : index
    %6 = vector.load %arg6[%c0_7, %c0_8] : memref<32x32xbf16, #tpu.memory_space<vmem>>, vector<32x32xbf16>
    %cst_9 = arith.constant dense<0.000000e+00> : vector<32x128xf32>
    %7 = tpu.matmul %6, %2, %cst_9 {dimension_numbers = #tpu.dot_dimension_numbers<[1], [0], [0], [1], [0, 0, 1, 1], [], []>} : vector<32x32xbf16>, vector<32x128xbf16>, vector<32x128xf32> -> vector<32x128xf32>
    %8 = arith.truncf %7 : vector<32x128xf32> to vector<32x128xbf16>
    %c0_10 = arith.constant 0 : index
    %c0_11 = arith.constant 0 : index
    %9 = vector.load %arg7[%c0_10, %c0_11] : memref<128x128xbf16, #tpu.memory_space<vmem>>, vector<128x128xbf16>
    %cst_12 = arith.constant dense<0.000000e+00> : vector<32x128xf32>
    %10 = tpu.matmul %5, %9, %cst_12 {dimension_numbers = #tpu.dot_dimension_numbers<[1], [0], [0], [1], [0, 0, 1, 1], [], []>} : vector<32x128xbf16>, vector<128x128xbf16>, vector<32x128xf32> -> vector<32x128xf32>
    %c0_13 = arith.constant 0 : index
    %c0_14 = arith.constant 0 : index
    %11 = vector.load %arg8[%c0_13, %c0_14] : memref<128x128xbf16, #tpu.memory_space<vmem>>, vector<128x128xbf16>
    %cst_15 = arith.constant dense<0.000000e+00> : vector<32x128xf32>
    %12 = tpu.matmul %8, %11, %cst_15 {dimension_numbers = #tpu.dot_dimension_numbers<[1], [0], [0], [1], [0, 0, 1, 1], [], []>} : vector<32x128xbf16>, vector<128x128xbf16>, vector<32x128xf32> -> vector<32x128xf32>
    %13 = arith.subf %10, %12 : vector<32x128xf32>
    %c0_16 = arith.constant 0 : index
    %c0_17 = arith.constant 0 : index
    %c0_18 = arith.constant 0 : index
    %c0_19 = arith.constant 0 : index
    %c0_20 = arith.constant 0 : index
    %c0_21 = arith.constant 0 : index
    %14 = vector.load %arg9[%c0_16, %c0_17, %c0_18, %c0_19, %c0_20, %c0_21] : memref<1x1x1x1x32x128xf32, #tpu.memory_space<vmem>>, vector<1x1x1x1x32x128xf32>
    %15 = vector.shape_cast %14 : vector<1x1x1x1x32x128xf32> to vector<32x128xf32>
    %16 = vector.shape_cast %13 : vector<32x128xf32> to vector<1x1x1x1x32x128xf32>
    tpu.vector_store %arg9[%c0_16, %c0_17, %c0_18, %c0_19, %c0_20, %c0_21], %16 {strides = array<i32>} : memref<1x1x1x1x32x128xf32, #tpu.memory_space<vmem>>, vector<1x1x1x1x32x128xf32>,
    %c0_22 = arith.constant 0 : index
    %c0_23 = arith.constant 0 : index
    %17 = vector.load %arg8[%c0_22, %c0_23] : memref<128x128xbf16, #tpu.memory_space<vmem>>, vector<128x128xbf16>
    %cst_24 = arith.constant dense<0.000000e+00> : vector<32x128xf32>
    %18 = tpu.matmul %5, %17, %cst_24 {dimension_numbers = #tpu.dot_dimension_numbers<[1], [0], [0], [1], [0, 0, 1, 1], [], []>} : vector<32x128xbf16>, vector<128x128xbf16>, vector<32x128xf32> -> vector<32x128xf32>
    %c0_25 = arith.constant 0 : index
    %c0_26 = arith.constant 0 : index
    %19 = vector.load %arg7[%c0_25, %c0_26] : memref<128x128xbf16, #tpu.memory_space<vmem>>, vector<128x128xbf16>
    %cst_27 = arith.constant dense<0.000000e+00> : vector<32x128xf32>
    %20 = tpu.matmul %8, %19, %cst_27 {dimension_numbers = #tpu.dot_dimension_numbers<[1], [0], [0], [1], [0, 0, 1, 1], [], []>} : vector<32x128xbf16>, vector<128x128xbf16>, vector<32x128xf32> -> vector<32x128xf32>
    %21 = arith.addf %18, %20 : vector<32x128xf32>
    %cst_28 = arith.constant 0.000000e+00 : f32
    %22 = vector.broadcast %cst_28 : f32 to vector<32x128xf32>
    %23 = arith.subf %22, %21 : vector<32x128xf32>
    %c0_29 = arith.constant 0 : index
    %c0_30 = arith.constant 0 : index
    %c0_31 = arith.constant 0 : index
    %c0_32 = arith.constant 0 : index
    %c0_33 = arith.constant 0 : index
    %c0_34 = arith.constant 0 : index
    %24 = vector.load %arg10[%c0_29, %c0_30, %c0_31, %c0_32, %c0_33, %c0_34] : memref<1x1x1x1x32x128xf32, #tpu.memory_space<vmem>>, vector<1x1x1x1x32x128xf32>
    %25 = vector.shape_cast %24 : vector<1x1x1x1x32x128xf32> to vector<32x128xf32>
    %26 = vector.shape_cast %23 : vector<32x128xf32> to vector<1x1x1x1x32x128xf32>
    tpu.vector_store %arg10[%c0_29, %c0_30, %c0_31, %c0_32, %c0_33, %c0_34], %26 {strides = array<i32>} : memref<1x1x1x1x32x128xf32, #tpu.memory_space<vmem>>, vector<1x1x1x1x32x128xf32>,
    return
  }
  func.func @transform_0(%arg0: i32, %arg1: i32, %arg2: i32, %arg3: i32) -> (i32, i32, i32, i32, i32, i32) {
    %c0_i32 = arith.constant 0 : i32
    %c0_i32_0 = arith.constant 0 : i32
    %c0_i32_1 = arith.constant 0 : i32
    return %arg0, %arg1, %arg2, %arg3, %c0_i32, %c0_i32_0 : i32, i32, i32, i32, i32, i32
  }
  func.func @transform_1(%arg0: i32, %arg1: i32, %arg2: i32, %arg3: i32) -> (i32, i32) {
    %c0_i32 = arith.constant 0 : i32
    %c0_i32_0 = arith.constant 0 : i32
    %c0_i32_1 = arith.constant 0 : i32
    return %c0_i32, %c0_i32_0 : i32, i32
  }
  func.func @transform_2(%arg0: i32, %arg1: i32, %arg2: i32, %arg3: i32) -> (i32, i32) {
    %c0_i32 = arith.constant 0 : i32
    %c0_i32_0 = arith.constant 0 : i32
    %c0_i32_1 = arith.constant 0 : i32
    return %c0_i32, %c0_i32_0 : i32, i32
  }
  func.func @transform_3(%arg0: i32, %arg1: i32, %arg2: i32, %arg3: i32) -> (i32, i32) {
    %c0_i32 = arith.constant 0 : i32
    %c0_i32_0 = arith.constant 0 : i32
    %c0_i32_1 = arith.constant 0 : i32
    return %c0_i32, %c0_i32_0 : i32, i32
  }
  func.func @transform_4(%arg0: i32, %arg1: i32, %arg2: i32, %arg3: i32) -> (i32, i32) {
    %c0_i32 = arith.constant 0 : i32
    %c0_i32_0 = arith.constant 0 : i32
    %c0_i32_1 = arith.constant 0 : i32
    return %c0_i32, %c0_i32_0 : i32, i32
  }
  func.func @transform_5(%arg0: i32, %arg1: i32, %arg2: i32, %arg3: i32) -> (i32, i32, i32, i32, i32, i32) {
    %c0_i32 = arith.constant 0 : i32
    %c0_i32_0 = arith.constant 0 : i32
    %c0_i32_1 = arith.constant 0 : i32
    return %arg0, %arg1, %arg2, %arg3, %c0_i32, %c0_i32_0 : i32, i32, i32, i32, i32, i32
  }
  func.func @transform_6(%arg0: i32, %arg1: i32, %arg2: i32, %arg3: i32) -> (i32, i32, i32, i32, i32, i32) {
    %c0_i32 = arith.constant 0 : i32
    %c0_i32_0 = arith.constant 0 : i32
    %c0_i32_1 = arith.constant 0 : i32
    return %arg0, %arg1, %arg2, %arg3, %c0_i32, %c0_i32_0 : i32, i32, i32, i32, i32, i32
  }
}

</mosaic_0001>

<bundles_post_ra>
// kernel: tpu_custom_call.1
= control target key start
LH: loop header
LB: loop body
LE: loop exit
PB: predicated region body
PF: predicated region fallthrough
CT: control target
= control target key end

     0   :  { %s2161_s0 = inlined_call_operand.hbm [shape: f32[1,1,1,3,32,128], index: 0, kind: input, shape index: {}]   ;;  %s2162_s1 = inlined_call_operand.hbm [shape: bf16[32,32], index: 1, kind: input, shape index: {}]   ;;  %s2163_s2 = inlined_call_operand.hbm [shape: bf16[32,32], index: 2, kind: input, shape index: {}]   ;;  %s2164_s3 = inlined_call_operand.hbm [shape: bf16[128,128], index: 3, kind: input, shape index: {}]   ;;  %s2165_s4 = inlined_call_operand.hbm [shape: bf16[128,128], index: 4, kind: input, shape index: {}]   ;;  %s2166_s5 = inlined_call_operand.hbm [shape: f32[1,1,1,3,32,128], index: 5, kind: output, shape index: {0}]   ;;  %s2167_s6 = inlined_call_operand.hbm [shape: f32[1,1,1,3,32,128], index: 6, kind: output, shape index: {1}]  }
   0x1   :  { %2168 = sst [smem:[#allocation19_spill]] %s2162_s1 }
   0x2   :  { %2169 = sst [smem:[#allocation20_spill]] %s2163_s2 }
   0x3   :  { %12 = vsyncpa [#allocation3], 0 }
   0x4   :  { %14 = vsyncpa [#allocation3 + $0x1], 0 }
   0x5   :  { %15 = vsyncpa [#allocation6], 0 }
   0x6   :  { %16 = vsyncpa [#allocation9], 0 }
   0x7   :  { %17 = vsyncpa [#allocation4], 0 }
   0x8   :  { %19 = vsyncpa [#allocation4 + $0x1], 0 }
   0x9   :  { %20 = vsyncpa [#allocation13], 0 }
   0xa   :  { %22 = vsyncpa [#allocation13 + $0x1], 0  ;;  %s1896_s21 = smov 0   ;;  %s1898_s22 = smov 0  }
   0xb   :  { %s1900_s23 = smov 0   ;;  %s1902_s24 = smov 0  }
   0xc   :  { %s1904_s25 = smov 0   ;;  %s1906_s26 = smov 0  }
   0xd LB: > { %s1232_s27 = sadd.s32 4294967295, %s1846_s26   ;;  %s1233_s28 = sadd.s32 4294967294, %s1846_s26   ;;  %s1846_s26 = sphi %s1906_s26, %s28_s26   ;;  %s1842_s25 = sphi %s1904_s25, %s2185_s25   ;;  %s1838_s24 = sphi %s1902_s24, %s2184_s24   ;;  %s1834_s23 = sphi %s1900_s23, %s2183_s23   ;;  %s1830_s22 = sphi %s1898_s22, %s2182_s22   ;;  %s1826_s21 = sphi %s1896_s21, %s2181_s21  }
   0xe   : > { %p80_p0 = scmp.ne.s32.totalorder %s1830_s22, %s1826_s21  ;;  %p1930_p1 = scmp.eq.s32.totalorder %s1232_s27, 0 }
   0xf   : > { %p1934_p2 = scmp.eq.s32.totalorder %s1232_s27, 2  ;;  %p200_p3 = scmp.eq.s32.totalorder %s1233_s28, 2 }
  0x10   : > { %p1940_p4 = por %p1930_p1, %p80_p0  ;;  %p1234_p5 = scmp.ge.s32.totalorder %s1846_s26, 1 }
  0x11   : > { %p1945_p6 = por %p200_p3, %p80_p0  ;;  %p239_p7 = scmp.lt.s32.totalorder %s1846_s26, 4 }
  0x12   : > { %s1848_s10 = smov [#allocation5]   ;;  %s1849_s13 = smov [#allocation8]  }
  0x13   : > { %s2173_s8 = scalar_select %p1945_p6, 1, 0 }
  0x14   : > { %p1950_p8 = pnand %p1234_p5, %p239_p7  ;;  %s251_s11 = sshll.u32 %s1848_s10, 4  ;;  %s252_s11 = int_to_ptr.vmem [resolvable:$true] %s251_s11 }
  0x15   : > { %s277_s14 = sshll.u32 %s1849_s13, 4  ;;  %s1850_s15 = smov [#allocation7]   ;;  %s278_s14 = int_to_ptr.vmem [resolvable:$true] %s277_s14 }
  0x16   : > { %p1468_p9 = pneg %p1950_p8  ;;  %s264_s16 = sshll.u32 %s1850_s15, 4  ;;  %s265_s16 = int_to_ptr.vmem [resolvable:$true] %s264_s16 }
  0x17   : > { %s1607_s17 = scalar_lea.vmem %s252_s11, 256  ;;  %p1615_p3 = scmp.lt.s32.totalorder %s252_s11, %s252_s11 }
  0x18   : > { %p1958_p10 = pnand %p1468_p9, %p1930_p1  ;;  %p1608_p12 = scmp.ne.s32.totalorder %s252_s11, %s1607_s17 }
  0x19   : > { %p1616_p5 = scmp.lt.s32.totalorder %s1607_s17, %s1607_s17 }
  0x1a   : > { %p1598_p11 = pneg %p1958_p10 }
  0x1b   : > { %p1617_p7 = por %p1616_p5, %p1615_p3 }
  0x1c   : > { %p1610_p13 = pnand %p1608_p12, %p1598_p11 }
  0x1e   : > { %p1611_p0 = pneg %p1610_p13 }
  0x20   : > { %p1618_p9 = pnand %p1617_p7, %p1611_p0 }
  0x22   : > { %1621 = shalt.err (!%p1618_p9)
}
  0x23   : > { %s1851_s18 = smov 64   ;;  %s1852_s19 = smov 4  }
  0x24   : > { %s2176_s1 = sld [smem:[#allocation19_spill]]  ;;  %s1633_s28 = scalar_lea.vmem %s278_s14, 1024 }
  0x25   : > { %p1634_p12 = scmp.ne.s32.totalorder %s278_s14, %s1633_s28  ;;  %p1641_p0 = scmp.lt.s32.totalorder %s278_s14, %s278_s14 }
  0x26   : > { %p1642_p5 = scmp.lt.s32.totalorder %s1633_s28, %s1633_s28 }
  0x27   : > { %p1636_p13 = pnand %p1634_p12, %p1598_p11 }
  0x28   : > { %p1643_p7 = por %p1642_p5, %p1641_p0 }
  0x29   : > { %p1637_p3 = pneg %p1636_p13 }
  0x2a   : > { %1471 = dma.hbm_to_vmem [thread:$0]  (!%p1958_p10), %s2176_s1, 256, %s252_s11, [#allocation6], %s1851_s18, %s1851_s18, %s1852_s19  }
  0x2b   : > { %p1644_p9 = pnand %p1643_p7, %p1637_p3 }
  0x2d   : > { %1647 = shalt.err (!%p1644_p9)
}
  0x2e   : > { %1477 = dma.hbm_to_vmem [thread:$0]  (!%p1958_p10), %s2164_s3, 1024, %s278_s14, [#allocation9], %s1851_s18, %s1851_s18, %s1852_s19  }
  0x2f   : > { %s1659_s11 = scalar_lea.vmem %s265_s16, 256  ;;  %p1667_p0 = scmp.lt.s32.totalorder %s265_s16, %s265_s16 }
  0x30   : > { %p1660_p6 = scmp.ne.s32.totalorder %s265_s16, %s1659_s11  ;;  %p1668_p3 = scmp.lt.s32.totalorder %s1659_s11, %s1659_s11 }
  0x32   : > { %p1662_p12 = pnand %p1660_p6, %p1598_p11  ;;  %p1669_p5 = por %p1668_p3, %p1667_p0 }
  0x34   : > { %p1663_p13 = pneg %p1662_p12 }
  0x36   : > { %p1670_p7 = pnand %p1669_p5, %p1663_p13 }
  0x38   : > { %1673 = shalt.err (!%p1670_p7)
}
  0x39   : > { %s2177_s2 = sld [smem:[#allocation20_spill]]  ;;  %s1853_s14 = smov [#allocation10]  }
  0x3a   : > { %s290_s20 = sshll.u32 %s1853_s14, 4  ;;  %s291_s20 = int_to_ptr.vmem [resolvable:$true] %s290_s20 }
  0x3b   : > { %s1685_s27 = scalar_lea.vmem %s291_s20, 1024  ;;  %p1693_p13 = scmp.lt.s32.totalorder %s291_s20, %s291_s20 }
  0x3c   : > { %p1686_p6 = scmp.ne.s32.totalorder %s291_s20, %s1685_s27  ;;  %p1694_p0 = scmp.lt.s32.totalorder %s1685_s27, %s1685_s27 }
  0x3e   : > { %p1688_p9 = pnand %p1686_p6, %p1598_p11  ;;  %p1695_p3 = por %p1694_p0, %p1693_p13 }
  0x3f   : > { %1474 = dma.hbm_to_vmem [thread:$0]  (!%p1958_p10), %s2177_s2, 256, %s265_s16, [#allocation6], %s1851_s18, %s1851_s18, %s1852_s19  }
  0x40   : > { %p1689_p12 = pneg %p1688_p9 }
  0x42   : > { %p1696_p5 = pnand %p1695_p3, %p1689_p12 }
  0x44   : > { %1699 = shalt.err (!%p1696_p5)
}
  0x45   : > { %1480 = dma.hbm_to_vmem [thread:$0]  (!%p1958_p10), %s2165_s4, 1024, %s291_s20, [#allocation9], %s1851_s18, %s1851_s18, %s1852_s19  }
  0x46   : > { %s43_s10 = sadd.s32 1, %s1842_s25  ;;  %s67_s12 = sadd.s32 1, %s1834_s23 }
  0x47   : > { %p44_p11 = scmp.ge.s32.totalorder %s43_s10, 3  ;;  %p74_p7 = scmp.ne.s32.totalorder %s1834_s23, %s1830_s22 }
  0x48   : > { %p75_p6 = scmp.eq.s32.totalorder %s1846_s26, 0  ;;  %p1496_p9 = scmp.lt.s32.totalorder %s1846_s26, 3 }
  0x49   : > { %s2187_s10 = smov (%p44_p11, %s43_s10), 0  ;;  %p2018_p13 = por %p1934_p2, %p74_p7 }
  0x4a   : > { %p76_p12 = por %p75_p6, %p74_p7  ;;  %s63_s11 = ssub.s32 %s1842_s25, %s2187_s10 }
  0x4b   : > { %s304_s15 = sand.u32 1, %s1834_s23   ;;  %p65_p0 = scmp.eq.s32.totalorder %s63_s11, 0 }
  0x4c   : > { %s1240_s18 = sshll.u32 %s304_s15, 5  ;;  %s1299_s19 = sshll.u32 %s1842_s25, 9 }
  0x4d   : > { %s2027_s17 = scalar_select %p65_p0, %s1834_s23, %s67_s12  }
  0x4e   : > { %s320_s27 = scalar_lea.hbm %s2161_s0, %s1299_s19  ;;  %s308_s16 = scalar_lea.vmem [#allocation2], %s1240_s18 }
  0x4f   : > { %s321_s28 = sshll.u32 %s308_s16, 4  ;;  %p2034_p10 = pnand %p1496_p9, %p76_p12  ;;  %s322_s28 = int_to_ptr.vmem [resolvable:$true] %s321_s28 }
  0x50   : > { %s305_s1 = scalar_lea.sflag [#allocation3], %s304_s15  ;;  %s1713_s11 = scalar_lea.vmem %s322_s28, 512 }
  0x51   : > { %p1702_p2 = pneg %p2034_p10  ;;  %p1714_p3 = scmp.ne.s32.totalorder %s322_s28, %s1713_s11 }
  0x52   : > { %s1854_s12 = smov [#allocation2]  }
  0x53   : > { %p1716_p5 = pnand %p1714_p3, %p1702_p2  ;;  %s1718_s2 = sshll.u32 %s1854_s12, 4  ;;  %s1719_s2 = int_to_ptr.vmem [resolvable:$false] %s1718_s2 }
  0x54   : > { %s1720_s19 = scalar_lea.vmem %s1719_s2, 1024  ;;  %p1721_p7 = scmp.lt.s32.totalorder %s322_s28, %s1719_s2 }
  0x55   : > { %p1717_p11 = pneg %p1716_p5  ;;  %p1722_p6 = scmp.lt.s32.totalorder %s1720_s19, %s1713_s11 }
  0x57   : > { %p1723_p0 = por %p1722_p6, %p1721_p7 }
  0x59   : > { %p1724_p9 = pnand %p1723_p0, %p1717_p11 }
  0x5b   : > { %1727 = shalt.err (!%p1724_p9)
}
  0x5c   : > { %s1855_s18 = smov 128   ;;  %s1856_s14 = smov 8  }
  0x5d   : > { %1484 = dma.hbm_to_vmem [thread:$0]  (!%p2034_p10), %s320_s27, 512, %s322_s28, %s305_s1, %s1855_s18, %s1855_s18, %s1856_s14  }
  0x5e   : > { %333 = sbr.rel (%p1950_p8) target bundleno = 565 (0x235), region = 40  ;;  %s2045_s15 = sand.u32 (!%p1950_p8), 1, %s1830_s22  }
  0x5f   : > { %s2048_s20 = sshll.u32 (!%p1950_p8), %s2045_s15, 5  ;;  %s336_s2 = scalar_lea.sflag (!%p1950_p8), [#allocation3], %s2045_s15 }
  0x60   : > { %s339_s16 = scalar_lea.vmem (!%p1950_p8), [#allocation2], %s2048_s20 }
  0x63   : > { %1805 = dma.done.wait (%p1940_p4), %s336_s2, 512  }
  0x64   : > { %1807 = vsyncadd (%p1940_p4), %s336_s2, 4294966784 }
  0x65   : > { %1809 = dma.done.wait (%p1930_p1), [#allocation6], 512  }
  0x66   : > { %1811 = vsyncadd (%p1930_p1), [#allocation6], 4294966784 }
  0x67   : > { %1813 = dma.done.wait (%p1930_p1), [#allocation9], 2048  }
  0x68   : > { %1815 = vsyncadd (%p1930_p1), [#allocation9], 4294965248  ;;  %v392_v0 = vld [vmem:[%s339_s16 + $0x10] sm:$0xff]  ;;  %v393_v1 = vld [vmem:[%s339_s16 + $0x18] sm:$0xff]  ;;  %vm410_vm0 = vcmask 261120   ;;  %s381_s1 = scalar_lea.vmem [#allocation11], %s2048_s20 }
  0x69   : > { %v390_v2 = vld [vmem:[%s339_s16] sm:$0xff]  ;;  %v395_v3 = vpack.c.bf16 %v393_v1, %v392_v0  ;;  %v391_v4 = vld [vmem:[%s339_s16 + $0x8] sm:$0xff]  ;;  %v1561_v7 = vld [vmem:[#allocation7] sm:$0xff]   ;;  %s1032_s29 = sshll.u32 %s381_s1, 4  ;;  %s1300_s7 = sshll.u32 %s1838_s24, 9  ;;  %s2070_s29 = int_to_ptr.vmem [resolvable:$true] %s1032_s29 }
  0x6a   : > { %v394_v5 = vpack.c.bf16 %v391_v4, %v390_v2  ;;  %v1560_v6 = vld [vmem:[#allocation5] sm:$0xff]   ;;  %v1562_v8 = vld [vmem:[#allocation5 + $0x8] sm:$0xff]   ;;  %v1563_v9 = vld [vmem:[#allocation7 + $0x8] sm:$0xff]   ;;  %1362 = vmatprep.mubr.msk.bf16.mxu1 %vm410_vm0, %v1561_v7  ;;  %s2077_s28 = scalar_lea.hbm %s2166_s5, %s1300_s7  ;;  %s1008_s30 = scalar_lea.sflag [#allocation4], %s2045_s15 }
  0x6b   : > { %1350 = vmatprep.subr.bf16.mxu0 %v395_v3  ;;  %1358 = vmatprep.subr.bf16.mxu1 %v395_v3  ;;  %v1564_v10 = vld [vmem:[#allocation8 + $0x38] sm:$0xff]   ;;  %v1566_v12 = vld [vmem:[#allocation8 + $0x30] sm:$0xff]   ;;  %v1568_v14 = vld [vmem:[#allocation8 + $0x28] sm:$0xff]   ;;  %s1728_s11 = scalar_lea.vmem %s2070_s29, 512  ;;  %s1857_s12 = smov [#allocation11]  }
  0x6c   : > { %1351 = vmatpush3.bf16.msra.mxu0 %v395_v3  ;;  %1359 = vmatpush3.bf16.msra.mxu1 %v395_v3  ;;  %v1565_v11 = vld [vmem:[#allocation10 + $0x38] sm:$0xff]   ;;  %v1567_v13 = vld [vmem:[#allocation10 + $0x30] sm:$0xff]   ;;  %v1569_v15 = vld [vmem:[#allocation10 + $0x28] sm:$0xff]   ;;  %p1729_p1 = scmp.ne.s32.totalorder %s2070_s29, %s1728_s11  ;;  %s1732_s19 = sshll.u32 %s1857_s12, 4  ;;  %s1733_s19 = int_to_ptr.vmem [resolvable:$false] %s1732_s19 }
  0x6d   : > { %1352 = vmatprep.subr.bf16.mxu0 %v394_v5  ;;  %1360 = vmatprep.subr.bf16.mxu1 %v394_v5  ;;  %v1570_v16 = vld [vmem:[#allocation8 + $0x20] sm:$0xff]   ;;  %v1572_v18 = vld [vmem:[#allocation8 + $0x18] sm:$0xff]   ;;  %v1574_v20 = vld [vmem:[#allocation8 + $0x10] sm:$0xff]   ;;  %s1734_s18 = scalar_lea.vmem %s1733_s19, 1024  ;;  %p1735_p12 = scmp.lt.s32.totalorder %s2070_s29, %s1733_s19 }
  0x6e   : > { %1354 = vmatprep.mubr.msk.bf16.mxu0 %vm410_vm0, %v1560_v6  ;;  %v1571_v17 = vld [vmem:[#allocation10 + $0x20] sm:$0xff]   ;;  %v1573_v19 = vld [vmem:[#allocation10 + $0x18] sm:$0xff]   ;;  %v1575_v21 = vld [vmem:[#allocation10 + $0x10] sm:$0xff]   ;;  %p1730_p4 = pnand %p1729_p1, %p2018_p13  ;;  %p1736_p10 = scmp.lt.s32.totalorder %s1734_s18, %s1728_s11 }
  0x6f   : > { %v1576_v22 = vld [vmem:[#allocation8 + $0x8] sm:$0xff]   ;;  %v1578_v24 = vld [vmem:[#allocation8] sm:$0xff]   ;;  %v1580_v26 = vld [vmem:[#allocation8 + $0x38] sm:$0xff]  }
  0x70   : > { %1353 = vmatpush3.bf16.msra.mxu0 %v394_v5  ;;  %1361 = vmatpush3.bf16.msra.mxu1 %v394_v5  ;;  %v1577_v23 = vld [vmem:[#allocation10 + $0x8] sm:$0xff]   ;;  %v1579_v25 = vld [vmem:[#allocation10] sm:$0xff]   ;;  %v1581_v27 = vld [vmem:[#allocation10 + $0x38] sm:$0xff]   ;;  %p1731_p8 = pneg %p1730_p4  ;;  %p1737_p2 = por %p1736_p10, %p1735_p12 }
  0x71   : > { %1366 = vmatprep.subr.bf16.mxu0 %v1564_v10  ;;  %1386 = vmatprep.subr.bf16.mxu1 %v1565_v11  ;;  %v1582_v40 = vld [vmem:[#allocation8 + $0x30] sm:$0xff]   ;;  %v1584_v42 = vld [vmem:[#allocation8 + $0x28] sm:$0xff]   ;;  %v1586_v44 = vld [vmem:[#allocation8 + $0x20] sm:$0xff]  }
  0x72   : > { %v1583_v41 = vld [vmem:[#allocation10 + $0x30] sm:$0xff]   ;;  %v1585_v43 = vld [vmem:[#allocation10 + $0x28] sm:$0xff]   ;;  %v1587_v45 = vld [vmem:[#allocation10 + $0x20] sm:$0xff]   ;;  %p1738_p3 = pnand %p1737_p2, %p1731_p8 }
  0x73   : > { %1355 = vmatmul.mubr.msk.bf16.vlgmr.msra.gmra.mxu0 %vm410_vm0, %v1562_v8  ;;  %1363 = vmatmul.mubr.msk.bf16.vlgmr.msra.gmra.mxu1 %vm410_vm0, %v1563_v9  ;;  %v1588_v46 = vld [vmem:[#allocation8 + $0x18] sm:$0xff]   ;;  %v1590_v48 = vld [vmem:[#allocation8 + $0x10] sm:$0xff]   ;;  %v1592_v50 = vld [vmem:[#allocation8 + $0x8] sm:$0xff]  }
  0x74   : > { %1367 = vmatpush3.bf16.msra.mxu0 %v1564_v10  ;;  %1387 = vmatpush3.bf16.msra.mxu1 %v1565_v11  ;;  %v1589_v47 = vld [vmem:[#allocation10 + $0x18] sm:$0xff]   ;;  %v1591_v49 = vld [vmem:[#allocation10 + $0x10] sm:$0xff]   ;;  %v1593_v51 = vld [vmem:[#allocation10 + $0x8] sm:$0xff]  }
  0x75   : > { %1368 = vmatprep.subr.bf16.mxu0 %v1566_v12  ;;  %1388 = vmatprep.subr.bf16.mxu1 %v1567_v13  ;;  %v1594_v52 = vld [vmem:[#allocation8] sm:$0xff]  }
  0x76   : > { %v1595_v53 = vld [vmem:[#allocation10] sm:$0xff]  }
  0x78   : > { %1369 = vmatpush3.bf16.msra.mxu0 %v1566_v12  ;;  %1389 = vmatpush3.bf16.msra.mxu1 %v1567_v13 }
  0x79   : > { %1370 = vmatprep.subr.bf16.mxu0 %v1568_v14  ;;  %1390 = vmatprep.subr.bf16.mxu1 %v1569_v15 }
  0x7c   : > { %1371 = vmatpush3.bf16.msra.mxu0 %v1568_v14  ;;  %1391 = vmatpush3.bf16.msra.mxu1 %v1569_v15 }
  0x7d   : > { %1372 = vmatprep.subr.bf16.mxu0 %v1570_v16  ;;  %1392 = vmatprep.subr.bf16.mxu1 %v1571_v17 }
  0x80   : > { %1373 = vmatpush3.bf16.msra.mxu0 %v1570_v16  ;;  %1393 = vmatpush3.bf16.msra.mxu1 %v1571_v17 }
  0x81   : > { %1374 = vmatprep.subr.bf16.mxu0 %v1572_v18  ;;  %1394 = vmatprep.subr.bf16.mxu1 %v1573_v19 }
  0x84   : > { %1375 = vmatpush3.bf16.msra.mxu0 %v1572_v18  ;;  %1395 = vmatpush3.bf16.msra.mxu1 %v1573_v19 }
  0x85   : > { %1376 = vmatprep.subr.bf16.mxu0 %v1574_v20  ;;  %1396 = vmatprep.subr.bf16.mxu1 %v1575_v21 }
  0x88   : > { %1377 = vmatpush3.bf16.msra.mxu0 %v1574_v20  ;;  %1397 = vmatpush3.bf16.msra.mxu1 %v1575_v21 }
  0x89   : > { %1378 = vmatprep.subr.bf16.mxu0 %v1576_v22  ;;  %1398 = vmatprep.subr.bf16.mxu1 %v1577_v23 }
  0x8c   : > { %1379 = vmatpush3.bf16.msra.mxu0 %v1576_v22  ;;  %1399 = vmatpush3.bf16.msra.mxu1 %v1577_v23 }
  0x8d   : > { %1380 = vmatprep.subr.bf16.mxu0 %v1578_v24  ;;  %1400 = vmatprep.subr.bf16.mxu1 %v1579_v25 }
  0x90   : > { %1381 = vmatpush3.bf16.msra.mxu0 %v1578_v24  ;;  %1401 = vmatpush3.bf16.msra.mxu1 %v1579_v25 }
  0x91   : > { %1406 = vmatprep.subr.bf16.mxu0 %v1580_v26  ;;  %1426 = vmatprep.subr.bf16.mxu1 %v1581_v27 }
 0x133   : > { %v1356_v28 = vpop.f32.mrf.mxu0  ;;  %v1364_v29 = vpop.f32.mrf.mxu1 }
 0x135   : > { %v451_v30 = vpop.f32.mrf.mxu0  ;;  %v522_v31 = vpop.f32.mrf.mxu1 }
 0x137   : > { %v1357_v32 = vpop.f32.mrf.mxu0  ;;  %v1365_v33 = vpop.f32.mrf.mxu1 }
 0x138   : > { %v467_v38 = vpack.c.bf16 %v1357_v32, %v1356_v28  ;;  %v538_v39 = vpack.c.bf16 %v1365_v33, %v1364_v29 }
 0x139   : > { %v454_v34 = vpop.f32.mrf.mxu0  ;;  %v525_v35 = vpop.f32.mrf.mxu1 }
 0x13a   : > { %v466_v36 = vpack.c.bf16 %v454_v34, %v451_v30  ;;  %v537_v37 = vpack.c.bf16 %v525_v35, %v522_v31 }
 0x13c   : > { %1382 = vmatprep.mubr.bf16.mxu0 %v466_v36  ;;  %1402 = vmatprep.mubr.bf16.mxu1 %v537_v37 }
 0x13d   : > { %1383 = vmatmul.mubr.bf16.vlgmr.msra.gmra.mxu0 %v467_v38  ;;  %1403 = vmatmul.mubr.bf16.vlgmr.msra.gmra.mxu1 %v538_v39 }
 0x13e   : > { %1407 = vmatpush3.bf16.msra.mxu0 %v1580_v26  ;;  %1427 = vmatpush3.bf16.msra.mxu1 %v1581_v27 }
 0x13f   : > { %1422 = vmatprep.mubr.bf16.mxu0 %v537_v37  ;;  %1442 = vmatprep.mubr.bf16.mxu1 %v466_v36 }
 0x140   : > { %1408 = vmatprep.subr.bf16.mxu0 %v1582_v40  ;;  %1428 = vmatprep.subr.bf16.mxu1 %v1583_v41 }
 0x142   : > { %1409 = vmatpush3.bf16.msra.mxu0 %v1582_v40  ;;  %1429 = vmatpush3.bf16.msra.mxu1 %v1583_v41 }
 0x143   : > { %1410 = vmatprep.subr.bf16.mxu0 %v1584_v42  ;;  %1430 = vmatprep.subr.bf16.mxu1 %v1585_v43 }
 0x146   : > { %1411 = vmatpush3.bf16.msra.mxu0 %v1584_v42  ;;  %1431 = vmatpush3.bf16.msra.mxu1 %v1585_v43 }
 0x147   : > { %1412 = vmatprep.subr.bf16.mxu0 %v1586_v44  ;;  %1432 = vmatprep.subr.bf16.mxu1 %v1587_v45 }
 0x14a   : > { %1413 = vmatpush3.bf16.msra.mxu0 %v1586_v44  ;;  %1433 = vmatpush3.bf16.msra.mxu1 %v1587_v45 }
 0x14b   : > { %1414 = vmatprep.subr.bf16.mxu0 %v1588_v46  ;;  %1434 = vmatprep.subr.bf16.mxu1 %v1589_v47 }
 0x14e   : > { %1415 = vmatpush3.bf16.msra.mxu0 %v1588_v46  ;;  %1435 = vmatpush3.bf16.msra.mxu1 %v1589_v47 }
 0x14f   : > { %1416 = vmatprep.subr.bf16.mxu0 %v1590_v48  ;;  %1436 = vmatprep.subr.bf16.mxu1 %v1591_v49 }
 0x152   : > { %1417 = vmatpush3.bf16.msra.mxu0 %v1590_v48  ;;  %1437 = vmatpush3.bf16.msra.mxu1 %v1591_v49 }
 0x153   : > { %1418 = vmatprep.subr.bf16.mxu0 %v1592_v50  ;;  %1438 = vmatprep.subr.bf16.mxu1 %v1593_v51 }
 0x156   : > { %1419 = vmatpush3.bf16.msra.mxu0 %v1592_v50  ;;  %1439 = vmatpush3.bf16.msra.mxu1 %v1593_v51 }
 0x157   : > { %1420 = vmatprep.subr.bf16.mxu0 %v1594_v52  ;;  %1440 = vmatprep.subr.bf16.mxu1 %v1595_v53 }
 0x15a   : > { %1421 = vmatpush3.bf16.msra.mxu0 %v1594_v52  ;;  %1441 = vmatpush3.bf16.msra.mxu1 %v1595_v53 }
 0x15d   : > { %1423 = vmatmul.mubr.bf16.vlgmr.msra.gmra.mxu0 %v538_v39  ;;  %1443 = vmatmul.mubr.bf16.vlgmr.msra.gmra.mxu1 %v467_v38 }
 0x1fd   : > { %v1384_v54 = vpop.f32.mrf.mxu0  ;;  %v1404_v55 = vpop.f32.mrf.mxu1 }
 0x1fe   : > { %v767_v56 = vsub.f32 %v1384_v54, %v1404_v55 }
 0x1ff   : > { %v637_v57 = vpop.f32.mrf.mxu0  ;;  %v750_v58 = vpop.f32.mrf.mxu1 }
 0x200   : > { %771 = vst [vmem:[%s381_s1 + $0x10] sm:$0xff] %v767_v56  ;;  %v765_v59 = vsub.f32 %v637_v57, %v750_v58 }
 0x201   : > { %v1385_v60 = vpop.f32.mrf.mxu0  ;;  %v1405_v61 = vpop.f32.mrf.mxu1 }
 0x202   : > { %769 = vst [vmem:[%s381_s1] sm:$0xff] %v765_v59  ;;  %v768_v62 = vsub.f32 %v1385_v60, %v1405_v61 }
 0x203   : > { %v640_v63 = vpop.f32.mrf.mxu0  ;;  %v753_v0 = vpop.f32.mrf.mxu1 }
 0x204   : > { %772 = vst [vmem:[%s381_s1 + $0x18] sm:$0xff] %v768_v62  ;;  %v766_v1 = vsub.f32 %v640_v63, %v753_v0 }
 0x206   : > { %770 = vst [vmem:[%s381_s1 + $0x8] sm:$0xff] %v766_v1 }
 0x207   : > { %1741 = shalt.err (!%p1738_p3)
}
 0x208   : > { %s1742_s14 = scalar_lea.hbm %s2077_s28, 512  ;;  %s1746_s1 = scalar_lea.hbm %s2166_s5, 1536 }
 0x209   : > { %p1743_p5 = scmp.ne.s32.totalorder %s2077_s28, %s1742_s14  ;;  %p1747_p6 = scmp.lt.s32.totalorder %s2077_s28, %s2166_s5 }
 0x20a   : > { %p1748_p0 = scmp.lt.s32.totalorder %s1746_s1, %s1742_s14 }
 0x20b   : > { %p1744_p11 = pnand %p1743_p5, %p2018_p13 }
 0x20c   : > { %p1749_p9 = por %p1748_p0, %p1747_p6 }
 0x20d   : > { %p1745_p7 = pneg %p1744_p11 }
 0x20f   : > { %p1750_p1 = pnand %p1749_p9, %p1745_p7 }
 0x211   : > { %1753 = shalt.err (!%p1750_p1)
}
 0x212   : > { %s1858_s11 = smov 128   ;;  %s1859_s12 = smov 8  }
 0x213   : > { %1464 = dma.vmem_to_hbm [thread:$0]  (%p2018_p13), %s2070_s29, 512, %s2077_s28, %s1008_s30, %s1858_s11, %s1858_s11, %s1859_s12  }
 0x214   : > { %s388_s19 = scalar_lea.vmem [#allocation12], %s2048_s20  ;;  %s2113_s28 = scalar_lea.hbm %s2167_s6, %s1300_s7 }
 0x215   : > { %s1054_s18 = sshll.u32 %s388_s19, 4  ;;  %s1013_s30 = scalar_lea.sflag [#allocation13], %s2045_s15  ;;  %s2106_s18 = int_to_ptr.vmem [resolvable:$true] %s1054_s18 }
 0x216   : > { %s1754_s14 = scalar_lea.vmem %s2106_s18, 512  ;;  %s1860_s2 = smov [#allocation12]  }
 0x217   : > { %p1755_p4 = scmp.ne.s32.totalorder %s2106_s18, %s1754_s14  ;;  %s1758_s16 = sshll.u32 %s1860_s2, 4  ;;  %s1759_s16 = int_to_ptr.vmem [resolvable:$false] %s1758_s16 }
 0x218   : > { %s1760_s1 = scalar_lea.vmem %s1759_s16, 1024  ;;  %p1761_p10 = scmp.lt.s32.totalorder %s2106_s18, %s1759_s16 }
 0x219   : > { %p1756_p8 = pnand %p1755_p4, %p2018_p13  ;;  %p1762_p2 = scmp.lt.s32.totalorder %s1760_s1, %s1754_s14 }
 0x21b   : > { %p1757_p12 = pneg %p1756_p8  ;;  %p1763_p3 = por %p1762_p2, %p1761_p10 }
 0x21d   : > { %v1424_v2 = vpop.f32.mrf.mxu0  ;;  %v1444_v3 = vpop.f32.mrf.mxu1  ;;  %p1764_p5 = pnand %p1763_p3, %p1757_p12 }
 0x21e   : > { %v993_v4 = vadd.f32 %v1444_v3, %v1424_v2 }
 0x21f   : > { %v887_v5 = vpop.f32.mrf.mxu0  ;;  %v984_v6 = vpop.f32.mrf.mxu1 }
 0x220   : > { %v1001_v7 = vsub.f32 0.0, %v993_v4  ;;  %v985_v8 = vadd.f32 %v984_v6, %v887_v5 }
 0x221   : > { %v1425_v9 = vpop.f32.mrf.mxu0  ;;  %v1445_v10 = vpop.f32.mrf.mxu1 }
 0x222   : > { %1005 = vst [vmem:[%s388_s19 + $0x10] sm:$0xff] %v1001_v7  ;;  %v999_v11 = vsub.f32 0.0, %v985_v8  ;;  %v996_v12 = vadd.f32 %v1445_v10, %v1425_v9 }
 0x223   : > { %v890_v13 = vpop.f32.mrf.mxu0  ;;  %v987_v14 = vpop.f32.mrf.mxu1 }
 0x224   : > { %1003 = vst [vmem:[%s388_s19] sm:$0xff] %v999_v11  ;;  %v1002_v15 = vsub.f32 0.0, %v996_v12  ;;  %v988_v16 = vadd.f32 %v987_v14, %v890_v13 }
 0x226   : > { %1006 = vst [vmem:[%s388_s19 + $0x18] sm:$0xff] %v1002_v15  ;;  %v1000_v17 = vsub.f32 0.0, %v988_v16 }
 0x228   : > { %1004 = vst [vmem:[%s388_s19 + $0x8] sm:$0xff] %v1000_v17 }
 0x229   : > { %1767 = shalt.err (!%p1764_p5)
}
 0x22a   : > { %s1768_s24 = scalar_lea.hbm %s2113_s28, 512  ;;  %s1772_s9 = scalar_lea.hbm %s2167_s6, 1536 }
 0x22b   : > { %p1769_p11 = scmp.ne.s32.totalorder %s2113_s28, %s1768_s24  ;;  %p1773_p0 = scmp.lt.s32.totalorder %s2113_s28, %s2167_s6 }
 0x22c   : > { %p1774_p9 = scmp.lt.s32.totalorder %s1772_s9, %s1768_s24 }
 0x22d   : > { %p1770_p7 = pnand %p1769_p11, %p2018_p13 }
 0x22e   : > { %p1775_p1 = por %p1774_p9, %p1773_p0 }
 0x22f   : > { %p1771_p6 = pneg %p1770_p7 }
 0x231   : > { %p1776_p4 = pnand %p1775_p1, %p1771_p6 }
 0x233   : > { %1779 = shalt.err (!%p1776_p4)
}
 0x234   : > { %1465 = dma.vmem_to_hbm [thread:$0]  (%p2018_p13), %s2106_s18, 512, %s2113_s28, %s1013_s30, %s1858_s11, %s1858_s11, %s1859_s12  }
 0x235 PF: > { %p1501_p8 = scmp.ge.s32.totalorder %s1846_s26, 2  ;;  %s1069_s29 = sand.u32 1, %s1826_s21  }
 0x236   : > { %p2180_p12 = scmp.ne.s32.totalorder %s2173_s8, 0  ;;  %s1070_s20 = scalar_lea.sflag [#allocation4], %s1069_s29 }
 0x238   : > { %p1486_p10 = pnand %p1501_p8, %p2180_p12 }
 0x23a   : > { %p1487_p2 = pneg %p1486_p10 }
 0x23c   : > { %1817 = dma.done.wait (%p1487_p2), %s1070_s20, 512  }
 0x23d   : > { %1819 = vsyncadd (%p1487_p2), %s1070_s20, 4294966784  ;;  %s1079_s14 = scalar_lea.sflag [#allocation13], %s1069_s29 }
 0x23e   : > { %1821 = dma.done.wait (%p1487_p2), %s1079_s14, 512  }
 0x23f   : > { %1823 = vsyncadd (%p1487_p2), %s1079_s14, 4294966784  ;;  %s28_s26 = sadd.s32 1, %s1846_s26   ;;  %s2181_s21 = smov %s1830_s22 }
 0x240   : > { %p25_p3 = scmp.ge.s32.totalorder %s28_s26, 5   ;;  %s2182_s22 = smov %s1834_s23 }
 0x241   : > { %s2183_s23 = smov %s2027_s17  ;;  %s2184_s24 = smov %s1842_s25 }
 0x242   : > { %s2185_s25 = smov %s2187_s10  ;;  %27 = sbr.rel (!%p25_p3) target bundleno = 13 (0xd), region = 118 }
 0x247   :  { %1084 = vsyncpa [#allocation3], 1 }
 0x248   :  { %1086 = vsyncpa [#allocation3 + $0x1], 1 }
 0x249   :  { %1087 = vsyncpa [#allocation6], 1 }
 0x24a   :  { %1088 = vsyncpa [#allocation9], 1 }
 0x24b   :  { %1089 = vsyncpa [#allocation4], 1 }
 0x24c   :  { %1091 = vsyncpa [#allocation4 + $0x1], 1 }
 0x24d   :  { %1092 = vsyncpa [#allocation13], 1 }
 0x24e   :  { %1094 = vsyncpa [#allocation13 + $0x1], 1 }

</bundles_post_ra>
